<compile_context>
chip_gen: v6e
topology: v6e:2x2x1
jax: 0.10.0
libtpu: 0.0.40
codegen_flags: <defaults>
</compile_context>

<pallas_src>
import math
import functools

import jax
import jax.numpy as jnp
from jax.experimental import pallas as pl
from jax.experimental.pallas import tpu as pltpu


# ----------------------------------------------------------------------------
# Parameter / buffer setup (deterministic, mirrors nn.Module.__init__)
# ----------------------------------------------------------------------------
def make_positional_encoding(d_model: int, max_len: int = 5000) -> jnp.ndarray:
    """Builds the sinusoidal PE buffer, shape [max_len, 1, d_model] (f32)."""
    position = jnp.arange(0, max_len, dtype=jnp.float32)[:, None]            # [L, 1]
    div_term = jnp.exp(
        jnp.arange(0, d_model, 2, dtype=jnp.float32) * (-math.log(10000.0) / d_model)
    )                                                                         # [D/2]
    angles = position * div_term                                              # [L, D/2]
    pe = jnp.zeros((max_len, d_model), dtype=jnp.float32)
    pe = pe.at[:, 0::2].set(jnp.sin(angles))
    pe = pe.at[:, 1::2].set(jnp.cos(angles))
    # torch: pe.unsqueeze(0).transpose(0, 1) -> [max_len, 1, d_model]
    return pe[:, None, :]


# ----------------------------------------------------------------------------
# Kernels  (x block: [TS, B*D] lane-dense, pe block: [TS, D] f32)
# ----------------------------------------------------------------------------
def _pe_add_kernel(x_ref, pe_ref, o_ref, *, batch: int, d: int):
    pe_row = pe_ref[...]                                   # (TS, D) f32
    for b in range(batch):                                 # unrolled; no pe concat
        sl = pl.ds(b * d, d)
        o_ref[:, sl] = (x_ref[:, sl].astype(jnp.float32) + pe_row).astype(o_ref.dtype)


def _pe_add_dropout_kernel(x_ref, pe_ref, m_ref, o_ref, *, batch: int, d: int):
    # m_ref holds a precomputed multiplicative mask: 0.0 (dropped) or 1/(1-p).
    pe_row = pe_ref[...]                                   # (TS, D) f32
    for b in range(batch):
        sl = pl.ds(b * d, d)
        y = x_ref[:, sl].astype(jnp.float32) + pe_row
        o_ref[:, sl] = (y * m_ref[:, sl].astype(jnp.float32)).astype(o_ref.dtype)


# ----------------------------------------------------------------------------
# Wrapper
# ----------------------------------------------------------------------------
def _round_up(n: int, m: int) -> int:
    return ((n + m - 1) // m) * m


def _pick_seq_tile(S: int, B: int, D: int, itemsize: int) -> int:
    """Sequence-tile rows: ~1 MiB x-tile, sublane-pack aligned, >= ~8 grid steps."""
    pack = {4: 8, 2: 16, 1: 32}.get(itemsize, 8)
    if S <= pack:
        return S                                        # full dim -> always legal
    row_bytes = B * D * itemsize
    target_tile_bytes = 1 << 20                         # roofline knee (~85% of HBM BW)
    ts = (max(1, target_tile_bytes // max(row_bytes, 1)) // pack) * pack
    ts = max(pack, ts)
    min_steps = 8                                       # let v7x's 2 TCs split the grid
    ts = min(ts, max(pack, _round_up(pl.cdiv(S, min_steps), pack)))
    ts = min(ts, _round_up(S, pack))
    return ts


def positional_encoding_forward(x, pe, *, dropout_p: float = 0.1,
                                train: bool = False, rng_key=None,
                                donate_x: bool = False):
    """
    x:  [S, B, D]        (any float dtype; bf16 halves HBM traffic)
    pe: [max_len, 1, D]  (max_len >= S), kept in f32 for the add
    returns [S, B, D] in x.dtype
    """
    S, B, D = x.shape

    if train and dropout_p >= 1.0:          # p == 1.0 boundary: drop everything
        return jnp.zeros_like(x)

    pe2 = pe[:S, 0, :].astype(jnp.float32)  # [S, D]   (glue: static slice)
    x2 = x.reshape(S, B * D)                # free row-major reshape -> lane-dense

    itemsize = jnp.dtype(x.dtype).itemsize
    ts = _pick_seq_tile(S, B, D, itemsize)
    grid = (pl.cdiv(S, ts),)                # ragged tail handled by Pallas block masking

    out_shape = jax.ShapeDtypeStruct((S, B * D), x.dtype)
    compiler_params = pltpu.CompilerParams(dimension_semantics=("parallel",))
    io_alias = {0: 0} if donate_x else {}   # x2 is input 0 in both paths

    x_spec = pl.BlockSpec((ts, B * D), lambda i: (i, 0))
    pe_spec = pl.BlockSpec((ts, D), lambda i: (i, 0))
    out_spec = pl.BlockSpec((ts, B * D), lambda i: (i, 0))

    if train and dropout_p > 0.0:
        # Precomputed inverted-dropout mask (kernel-external RNG; see TODO above).
        if rng_key is None:
            rng_key = jax.random.PRNGKey(0)
        keep = jax.random.bernoulli(rng_key, 1.0 - dropout_p, (S, B * D))
        scale = 1.0 / (1.0 - dropout_p)
        mask = jnp.where(keep, jnp.asarray(scale, x.dtype),
                         jnp.asarray(0.0, x.dtype))
        kernel = functools.partial(_pe_add_dropout_kernel, batch=B, d=D)
        out2 = pl.pallas_call(
            kernel,
            out_shape=out_shape,
            grid=grid,
            in_specs=[x_spec, pe_spec,
                      pl.BlockSpec((ts, B * D), lambda i: (i, 0))],
            out_specs=out_spec,
            compiler_params=compiler_params,
            input_output_aliases=io_alias,
        )(x2, pe2, mask)
    else:
        # eval mode: dropout is identity
        kernel = functools.partial(_pe_add_kernel, batch=B, d=D)
        out2 = pl.pallas_call(
            kernel,
            out_shape=out_shape,
            grid=grid,
            in_specs=[x_spec, pe_spec],
            out_specs=out_spec,
            compiler_params=compiler_params,
            input_output_aliases=io_alias,
        )(x2, pe2)

    return out2.reshape(S, B, D)


# ----------------------------------------------------------------------------
# Main
# ----------------------------------------------------------------------------
if __name__ == "__main__":
    S, B, D = 13, 2, 128        # [sequence length, batch size, embed dim]
    MAX_LEN = 64                # small max_len for the demo (module default 5000)
    DROPOUT_P = 0.1

    key = jax.random.PRNGKey(0)
    kx, kdrop = jax.random.split(key)
    x = jax.random.normal(kx, (S, B, D), dtype=jnp.float32)
    pe = make_positional_encoding(D, max_len=MAX_LEN)

    ref = x + pe[:S]

    # ---- eval mode (dropout is identity), matches module.eval() ----
    out = positional_encoding_forward(x, pe, dropout_p=DROPOUT_P, train=False)
    out = jax.block_until_ready(out)
    assert out.shape == (S, B, D)
    assert out.dtype == x.dtype
    assert jnp.allclose(out, ref, atol=1e-6, rtol=1e-6)

    # ---- train mode (inverted dropout, precomputed mask) ----
    out_tr = positional_encoding_forward(x, pe, dropout_p=DROPOUT_P,
                                         train=True, rng_key=kdrop)
    out_tr = jax.block_until_ready(out_tr)
    assert out_tr.shape == (S, B, D)
    scale = 1.0 / (1.0 - DROPOUT_P)
    dropped = (out_tr == 0.0)
    kept_ok = jnp.isclose(out_tr, ref * scale, atol=1e-5, rtol=1e-5)
    assert bool(jnp.all(dropped | kept_ok))
    keep_rate = float(1.0 - jnp.mean(dropped.astype(jnp.float32)))
    assert 0.75 < keep_rate < 0.99, keep_rate

    print("KERNEL_OK")
</pallas_src>

<mosaic_0001>
module attributes {stable_mosaic.version = 11 : i64} {
  func.func @_pe_add_kernel(%arg0: i32, %arg1: memref<8x256xf32, #tpu.memory_space<vmem>>, %arg2: memref<8x128xf32, #tpu.memory_space<vmem>>, %arg3: memref<8x256xf32, #tpu.memory_space<vmem>>) attributes {dimension_semantics = [#tpu.dimension_semantics<parallel>], iteration_bounds = array<i64: 2>, scalar_prefetch = 0 : i64, scratch_operands = 0 : i64, tpu.core_type = #tpu.core_type<tc>, window_params = [{transform_indices = @transform_0, window_bounds = array<i64: 8, 256>}, {transform_indices = @transform_1, window_bounds = array<i64: 8, 128>}, {transform_indices = @transform_2, window_bounds = array<i64: 8, 256>}]} {
    %c0 = arith.constant 0 : index
    %c0_0 = arith.constant 0 : index
    %0 = vector.load %arg2[%c0, %c0_0] : memref<8x128xf32, #tpu.memory_space<vmem>>, vector<8x128xf32>
    %c0_1 = arith.constant 0 : index
    %c0_2 = arith.constant 0 : index
    %1 = vector.load %arg1[%c0_1, %c0_2] : memref<8x256xf32, #tpu.memory_space<vmem>>, vector<8x128xf32>
    %2 = arith.addf %1, %0 : vector<8x128xf32>
    %c0_3 = arith.constant 0 : index
    %c0_4 = arith.constant 0 : index
    %3 = vector.load %arg3[%c0_3, %c0_4] : memref<8x256xf32, #tpu.memory_space<vmem>>, vector<8x128xf32>
    tpu.vector_store %arg3[%c0_3, %c0_4], %2 {strides = array<i32>} : memref<8x256xf32, #tpu.memory_space<vmem>>, vector<8x128xf32>,
    %c0_5 = arith.constant 0 : index
    %c128 = arith.constant 128 : index
    %4 = vector.load %arg1[%c0_5, %c128] : memref<8x256xf32, #tpu.memory_space<vmem>>, vector<8x128xf32>
    %5 = arith.addf %4, %0 : vector<8x128xf32>
    %c0_6 = arith.constant 0 : index
    %c128_7 = arith.constant 128 : index
    %6 = vector.load %arg3[%c0_6, %c128_7] : memref<8x256xf32, #tpu.memory_space<vmem>>, vector<8x128xf32>
    tpu.vector_store %arg3[%c0_6, %c128_7], %5 {strides = array<i32>} : memref<8x256xf32, #tpu.memory_space<vmem>>, vector<8x128xf32>,
    return
  }
  func.func @transform_0(%arg0: i32) -> (i32, i32) {
    %c0_i32 = arith.constant 0 : i32
    %c0_i32_0 = arith.constant 0 : i32
    return %arg0, %c0_i32 : i32, i32
  }
  func.func @transform_1(%arg0: i32) -> (i32, i32) {
    %c0_i32 = arith.constant 0 : i32
    %c0_i32_0 = arith.constant 0 : i32
    return %arg0, %c0_i32 : i32, i32
  }
  func.func @transform_2(%arg0: i32) -> (i32, i32) {
    %c0_i32 = arith.constant 0 : i32
    %c0_i32_0 = arith.constant 0 : i32
    return %arg0, %c0_i32 : i32, i32
  }
}

</mosaic_0001>

<bundles_post_ra>
// kernel: tpu_custom_call.1
= control target key start
LH: loop header
LB: loop body
LE: loop exit
PB: predicated region body
PF: predicated region fallthrough
CT: control target
= control target key end

     0   :  { %7 = vsyncpa [#allocation3], 0  ;;  %s721_s0 = inlined_call_operand.hbm [shape: f32[13,256], index: 0, kind: input, shape index: {}]   ;;  %s722_s1 = inlined_call_operand.hbm [shape: f32[13,128], index: 1, kind: input, shape index: {}]   ;;  %s723_s2 = inlined_call_operand.hbm [shape: f32[13,256], index: 2, kind: output, shape index: {}]  }
   0x1   :  { %9 = vsyncpa [#allocation3 + $0x1], 0 }
   0x2   :  { %10 = vsyncpa [#allocation6], 0 }
   0x3   :  { %12 = vsyncpa [#allocation6 + $0x1], 0 }
   0x4   :  { %13 = vsyncpa [#allocation4], 0 }
   0x5   :  { %15 = vsyncpa [#allocation4 + $0x1], 0  ;;  %s526_s9 = smov 0   ;;  %s528_s10 = smov 0  }
   0x6   :  { %s530_s11 = smov 0   ;;  %s532_s12 = smov 0  }
   0x7 LB: > { %s547_s13 = sadd.s32 4294967295, %s506_s12   ;;  %s312_s14 = sadd.s32 4294967294, %s506_s12   ;;  %s506_s12 = sphi %s532_s12, %s742_s12   ;;  %s502_s11 = sphi %s530_s11, %s741_s11   ;;  %s498_s10 = sphi %s528_s10, %s740_s10   ;;  %s494_s9 = sphi %s526_s9, %s739_s9  }
   0x8   : > { %s551_s15 = sadd.s32 1, %s506_s12   ;;  %s28_s16 = sadd.s32 1, %s502_s11 }
   0x9   : > { %s25_s17 = ssub.s32 %s506_s12, %s551_s15  ;;  %p35_p0 = scmp.ne.s32.totalorder %s502_s11, %s498_s10 }
   0xa   : > { %p26_p1 = scmp.eq.s32.totalorder %s25_s17, 0  ;;  %p36_p2 = scmp.eq.s32.totalorder %s506_s12, 0 }
   0xb   : > { %p41_p3 = scmp.ne.s32.totalorder %s498_s10, %s494_s9  ;;  %p42_p4 = scmp.eq.s32.totalorder %s547_s13, 0 }
   0xc   : > { %s563_s18 = scalar_select %p26_p1, %s502_s11, %s28_s16  }
   0xd   : > { %p565_p5 = por %p36_p2, %p35_p0  ;;  %p569_p6 = por %p42_p4, %p41_p3 }
   0xe   : > { %p91_p7 = scmp.eq.s32.totalorder %s547_s13, 1  ;;  %p97_p8 = scmp.eq.s32.totalorder %s312_s14, 1 }
   0xf   : > { %s727_s20 = scalar_select %p569_p6, 1, 0 }
  0x10   : > { %p348_p10 = scmp.lt.s32.totalorder %s506_s12, 2  ;;  %p576_p11 = por %p91_p7, %p35_p0 }
  0x11   : > { %p580_p12 = por %p97_p8, %p41_p3  ;;  %s585_s23 = sand.u32 1, %s502_s11  }
  0x12   : > { %s728_s21 = scalar_select %p576_p11, 1, 0 }
  0x13   : > { %s729_s22 = scalar_select %p580_p12, 1, 0 }
  0x14   : > { %s329_s24 = sshll.u32 %s506_s12, 8  ;;  %s315_s25 = sshll.u32 %s585_s23, 4 }
  0x15   : > { %s592_s28 = scalar_lea.hbm %s721_s0, %s329_s24  ;;  %s121_s29 = scalar_lea.vmem [#allocation2], %s315_s25 }
  0x16   : > { %s129_s30 = sshll.u32 %s121_s29, 4  ;;  %p596_p13 = pnand %p348_p10, %p565_p5  ;;  %s600_s30 = int_to_ptr.vmem [resolvable:$true] %s129_s30 }
  0x17   : > { %s118_s4 = scalar_lea.sflag [#allocation3], %s585_s23  ;;  %s382_s5 = scalar_lea.hbm %s592_s28, 256 }
  0x18   : > { %p383_p2 = scmp.ne.s32.totalorder %s592_s28, %s382_s5  ;;  %p384_p3 = pneg %p596_p13 }
  0x19   : > { %s387_s8 = scalar_lea.hbm %s721_s0, 512  ;;  %p388_p5 = scmp.lt.s32.totalorder %s592_s28, %s721_s0 }
  0x1a   : > { %p385_p4 = pnand %p384_p3, %p383_p2  ;;  %p389_p8 = scmp.lt.s32.totalorder %s387_s8, %s382_s5 }
  0x1c   : > { %p386_p7 = pneg %p385_p4  ;;  %p390_p10 = por %p389_p8, %p388_p5 }
  0x1e   : > { %p391_p9 = pnand %p390_p10, %p386_p7 }
  0x20   : > { %394 = shalt.err (!%p391_p9)
}
  0x21   : > { %s395_s17 = scalar_lea.vmem %s600_s30, 256  ;;  %s508_s19 = smov [#allocation2]  }
  0x22   : > { %p396_p0 = scmp.ne.s32.totalorder %s600_s30, %s395_s17  ;;  %s400_s24 = sshll.u32 %s508_s19, 4  ;;  %s401_s24 = int_to_ptr.vmem [resolvable:$false] %s400_s24 }
  0x23   : > { %s402_s25 = scalar_lea.vmem %s401_s24, 512  ;;  %p403_p1 = scmp.lt.s32.totalorder %s600_s30, %s401_s24 }
  0x24   : > { %p398_p2 = pnand %p396_p0, %p384_p3  ;;  %p404_p12 = scmp.lt.s32.totalorder %s402_s25, %s395_s17 }
  0x26   : > { %p399_p4 = pneg %p398_p2  ;;  %p405_p11 = por %p404_p12, %p403_p1 }
  0x28   : > { %p406_p5 = pnand %p405_p11, %p399_p4 }
  0x2a   : > { %409 = shalt.err (!%p406_p5)
}
  0x2b   : > { %340 = dma.hbm_to_vmem [thread:$0]  (!%p596_p13), %s592_s28, 256, %s600_s30, %s118_s4  }
  0x2c   : > { %p731_p9 = scmp.lt.s32.totalorder %s506_s12, 3  ;;  %p732_p0 = scmp.ge.s32.totalorder %s506_s12, 1 }
  0x2d   : > { %s318_s27 = sshll.u32 %s585_s23, 3  ;;  %s319_s29 = sshll.u32 %s506_s12, 7 }
  0x2e   : > { %p633_p7 = pnand %p732_p0, %p731_p9  ;;  %s642_s7 = scalar_lea.hbm %s722_s1, %s319_s29 }
  0x2f   : > { %s140_s8 = scalar_lea.vmem [#allocation5], %s318_s27  ;;  %s137_s28 = scalar_lea.sflag [#allocation6], %s585_s23 }
  0x30   : > { %s733_s26 = scalar_select %p633_p7, 1, 0 }
  0x31   : > { %s147_s14 = sshll.u32 %s140_s8, 4  ;;  %s410_s30 = scalar_lea.hbm %s642_s7, 128  ;;  %s148_s14 = int_to_ptr.vmem [resolvable:$true] %s147_s14 }
  0x32   : > { %p411_p11 = scmp.ne.s32.totalorder %s642_s7, %s410_s30  ;;  %s415_s17 = scalar_lea.hbm %s722_s1, 256 }
  0x33   : > { %p416_p8 = scmp.lt.s32.totalorder %s642_s7, %s722_s1  ;;  %p417_p10 = scmp.lt.s32.totalorder %s415_s17, %s410_s30 }
  0x34   : > { %p413_p12 = pnand %p411_p11, %p384_p3 }
  0x35   : > { %p418_p2 = por %p417_p10, %p416_p8 }
  0x36   : > { %p414_p1 = pneg %p413_p12 }
  0x38   : > { %p419_p4 = pnand %p418_p2, %p414_p1 }
  0x3a   : > { %422 = shalt.err (!%p419_p4)
}
  0x3b   : > { %s423_s25 = scalar_lea.vmem %s148_s14, 128  ;;  %s509_s23 = smov [#allocation5]  }
  0x3c   : > { %p424_p5 = scmp.ne.s32.totalorder %s148_s14, %s423_s25  ;;  %s428_s27 = sshll.u32 %s509_s23, 4  ;;  %s429_s27 = int_to_ptr.vmem [resolvable:$false] %s428_s27 }
  0x3d   : > { %s430_s29 = scalar_lea.vmem %s429_s27, 256  ;;  %p431_p11 = scmp.lt.s32.totalorder %s148_s14, %s429_s27 }
  0x3e   : > { %p426_p9 = pnand %p424_p5, %p384_p3  ;;  %p432_p12 = scmp.lt.s32.totalorder %s430_s29, %s423_s25 }
  0x40   : > { %p427_p0 = pneg %p426_p9  ;;  %p433_p6 = por %p432_p12, %p431_p11 }
  0x42   : > { %p434_p7 = pnand %p433_p6, %p427_p0 }
  0x44   : > { %437 = shalt.err (!%p434_p7)
}
  0x45   : > { %343 = dma.hbm_to_vmem [thread:$0]  (!%p596_p13), %s642_s7, 128, %s148_s14, %s137_s28  }
  0x46   : > { %p734_p1 = scmp.ne.s32.totalorder %s733_s26, 0 }
  0x47   : > { %s666_s5 = sand.u32 (!%p734_p1), 1, %s498_s10   ;;  %p735_p3 = scmp.ne.s32.totalorder (!%p734_p1), %s727_s20, 0 }
  0x48   : > { %156 = sbr.rel (%p734_p1) target bundleno = 106 (0x6a), region = 28  ;;  %s321_s6 = sshll.u32 (!%p734_p1), %s666_s5, 4 }
  0x49   : > { %s159_s8 = scalar_lea.sflag (!%p734_p1), [#allocation3], %s666_s5  ;;  %s162_s30 = scalar_lea.vmem (!%p734_p1), [#allocation2], %s321_s6 }
  0x4d   : > { %481 = dma.done.wait (%p735_p3), %s159_s8, 256  }
  0x4e   : > { %483 = vsyncadd (%p735_p3), %s159_s8, 4294967040  ;;  %s322_s3 = sshll.u32 %s666_s5, 3  ;;  %s168_s26 = scalar_lea.sflag [#allocation6], %s666_s5 }
  0x4f   : > { %s171_s7 = scalar_lea.vmem [#allocation5], %s322_s3 }
  0x50   : > { %485 = dma.done.wait (%p735_p3), %s168_s26, 128  }
  0x51   : > { %487 = vsyncadd (%p735_p3), %s168_s26, 4294967168  ;;  %s196_s14 = scalar_lea.vmem [#allocation7], %s321_s6  ;;  %s330_s4 = sshll.u32 %s547_s13, 8  ;;  %v197_v0 = vld [vmem:[%s171_s7] sm:$0xff]  ;;  %v201_v2 = vld [vmem:[%s162_s30 + $0x8] sm:$0xff] }
  0x52   : > { %s219_s28 = sshll.u32 %s196_s14, 4  ;;  %v198_v1 = vld [vmem:[%s162_s30] sm:$0xff]  ;;  %v202_v4 = vadd.f32 %v201_v2, %v197_v0  ;;  %s217_s20 = scalar_lea.hbm %s723_s2, %s330_s4  ;;  %s681_s28 = int_to_ptr.vmem [resolvable:$true] %s219_s28 }
  0x53   : > { %v199_v3 = vadd.f32 %v198_v1, %v197_v0  ;;  %s205_s19 = scalar_lea.sflag [#allocation4], %s666_s5  ;;  %s438_s24 = scalar_lea.vmem %s681_s28, 256 }
  0x54   : > { %203 = vst [vmem:[%s196_s14 + $0x8] sm:$0xff] %v202_v4  ;;  %p439_p6 = scmp.ne.s32.totalorder %s681_s28, %s438_s24  ;;  %p736_p13 = scmp.ne.s32.totalorder %s728_s21, 0 }
  0x55   : > { %200 = vst [vmem:[%s196_s14] sm:$0xff] %v199_v3  ;;  %s510_s13 = smov [#allocation7]  }
  0x56   : > { %p440_p7 = pnand %p439_p6, %p736_p13  ;;  %s442_s25 = sshll.u32 %s510_s13, 4  ;;  %s443_s25 = int_to_ptr.vmem [resolvable:$false] %s442_s25 }
  0x57   : > { %s444_s23 = scalar_lea.vmem %s443_s25, 512  ;;  %p445_p10 = scmp.lt.s32.totalorder %s681_s28, %s443_s25 }
  0x58   : > { %p441_p8 = pneg %p440_p7  ;;  %p446_p2 = scmp.lt.s32.totalorder %s444_s23, %s438_s24 }
  0x5a   : > { %p447_p4 = por %p446_p2, %p445_p10 }
  0x5c   : > { %p448_p5 = pnand %p447_p4, %p441_p8 }
  0x5e   : > { %451 = shalt.err (!%p448_p5)
}
  0x5f   : > { %s452_s27 = scalar_lea.hbm %s217_s20, 256  ;;  %s456_s6 = scalar_lea.hbm %s723_s2, 512 }
  0x60   : > { %p453_p9 = scmp.ne.s32.totalorder %s217_s20, %s452_s27  ;;  %p457_p12 = scmp.lt.s32.totalorder %s217_s20, %s723_s2 }
  0x61   : > { %p458_p1 = scmp.lt.s32.totalorder %s456_s6, %s452_s27 }
  0x62   : > { %p454_p0 = pnand %p453_p9, %p736_p13 }
  0x63   : > { %p459_p3 = por %p458_p1, %p457_p12 }
  0x64   : > { %p455_p11 = pneg %p454_p0 }
  0x66   : > { %p460_p6 = pnand %p459_p3, %p455_p11 }
  0x68   : > { %463 = shalt.err (!%p460_p6)
}
  0x69   : > { %335 = dma.vmem_to_hbm [thread:$0]  (%p736_p13), %s681_s28, 256, %s217_s20, %s205_s19  }
  0x6a PF: > { %s231_s3 = sand.u32 1, %s494_s9   ;;  %p737_p7 = scmp.ne.s32.totalorder %s729_s22, 0 }
  0x6b   : > { %p738_p8 = scmp.ge.s32.totalorder %s506_s12, 2  ;;  %s232_s26 = scalar_lea.sflag [#allocation4], %s231_s3 }
  0x6d   : > { %p345_p10 = pnand %p738_p8, %p737_p7 }
  0x6f   : > { %p346_p2 = pneg %p345_p10 }
  0x71   : > { %489 = dma.done.wait (%p346_p2), %s232_s26, 256  }
  0x72   : > { %491 = vsyncadd (%p346_p2), %s232_s26, 4294967040  ;;  %p18_p4 = scmp.ge.s32.totalorder %s551_s15, 4   ;;  %s739_s9 = smov %s498_s10 }
  0x73   : > { %s740_s10 = smov %s502_s11  ;;  %s741_s11 = smov %s563_s18 }
  0x74   : > { %s742_s12 = smov %s551_s15  ;;  %20 = sbr.rel (!%p18_p4) target bundleno = 7 (0x7), region = 86 }
  0x79   :  { %237 = vsyncpa [#allocation3], 1 }
  0x7a   :  { %239 = vsyncpa [#allocation3 + $0x1], 1 }
  0x7b   :  { %240 = vsyncpa [#allocation6], 1 }
  0x7c   :  { %242 = vsyncpa [#allocation6 + $0x1], 1 }
  0x7d   :  { %243 = vsyncpa [#allocation4], 1 }
  0x7e   :  { %245 = vsyncpa [#allocation4 + $0x1], 1 }

</bundles_post_ra>
